<compile_context>
chip_gen: v5e
topology: v5e:2x2
jax: 0.10.0
libtpu: 0.0.40
codegen_flags: <defaults>
</compile_context>

<pallas_src>
import jax
import jax.numpy as jnp
import numpy as np
from jax.experimental import pallas as pl
from jax.experimental.pallas import tpu as pltpu

LANE = 128


def _round_up(n, m):
    return ((n + m - 1) // m) * m


def mlp_kernel(x_ref, w1_ref, b1_ref, w2_ref, b2_ref, o_ref):
    # fc1 (BatchNorm folded into W1/b1), f32 accumulation on the MXU.
    h = jnp.dot(x_ref[...], w1_ref[...], preferred_element_type=jnp.float32)
    # f32 epilogue: bias + ReLU.  Dropout(0.5) is identity in eval mode.
    h = jnp.maximum(h + b1_ref[...], 0.0)
    # fc2: feed the MXU in the compute dtype (bf16 on the production path), f32 accumulation.
    out = jnp.dot(h.astype(w2_ref.dtype), w2_ref[...],
                  preferred_element_type=jnp.float32) + b2_ref[...]
    o_ref[...] = out.astype(o_ref.dtype)


def prepare_mlp_params(w1, b1, gamma, beta, running_mean, running_var, w2, b2,
                       eps=1e-5, compute_dtype=jnp.bfloat16):
    """Fold BatchNorm1d (eval) into fc1, pad feature dims, and cast weights to compute_dtype.

    Done ONCE per parameter set (outside the per-call hot path).
    Padding: E -> sublane tile only (full-extent dim of its blocks), H/O -> 128 (lane dims).
    Biases stay f32 (epilogue math is f32; MXU accumulation is f32 anyway).
    """
    H, E = w1.shape
    O = w2.shape[0]
    cdt = np.dtype(compute_dtype)
    sub = 8 if cdt.itemsize >= 4 else 16
    Ep = _round_up(E, sub)
    Hp = _round_up(H, LANE)
    Op = _round_up(O, LANE)

    inv_std = 1.0 / jnp.sqrt(running_var + eps)
    s = gamma * inv_std                                   # (H,)
    # (x @ W1.T + b1 - mean) * s + beta == x @ (W1.T * s) + ((b1 - mean) * s + beta)
    w1_fused = w1.T * s[None, :]                          # (E, H)
    b1_fused = (b1 - running_mean) * s + beta             # (H,)
    w2_t = w2.T                                           # (H, O)

    def pad2(a, rows, cols):
        return jnp.pad(a, ((0, rows - a.shape[0]), (0, cols - a.shape[1])))

    return {
        "w1": pad2(w1_fused, Ep, Hp).astype(compute_dtype),       # (Ep, Hp)
        "b1": pad2(b1_fused.reshape(1, H), 1, Hp).astype(jnp.float32),  # (1, Hp)
        "w2": pad2(w2_t, Hp, Op).astype(compute_dtype),            # (Hp, Op)
        "b2": pad2(b2.reshape(1, O), 1, Op).astype(jnp.float32),   # (1, Op)
        "dims": (E, H, O, Ep, Hp, Op),
        "compute_dtype": cdt,
    }


def _vmem_limit_bytes():
    """Per-generation VMEM budget with ~15% headroom for compiler-internal scratch."""
    try:
        cap = pltpu.get_tpu_info().vmem_capacity_bytes
    except Exception:
        cap = 64 * 1024 * 1024      # conservative fallback (v7x per-TensorCore size)
    return int(cap * 0.85)          # ~54 MiB on v7x, ~109 MiB on v5e/v6e


def _build_call(tm, Bp, Ep, Hp, Op, vmem_limit, cost, weight_pipeline_mode):
    wkw = {} if weight_pipeline_mode is None else {"pipeline_mode": weight_pipeline_mode}
    return pl.pallas_call(
        mlp_kernel,
        out_shape=jax.ShapeDtypeStruct((Bp, Op), jnp.float32),
        grid_spec=pltpu.PrefetchScalarGridSpec(
            num_scalar_prefetch=0,
            grid=(Bp // tm,),
            in_specs=[
                pl.BlockSpec((tm, Ep), lambda i: (i, 0)),           # x tile: streamed/pipelined
                pl.BlockSpec((Ep, Hp), lambda i: (0, 0), **wkw),    # fused W1: resident
                pl.BlockSpec((1, Hp), lambda i: (0, 0), **wkw),     # fused b1: resident
                pl.BlockSpec((Hp, Op), lambda i: (0, 0), **wkw),    # W2: resident
                pl.BlockSpec((1, Op), lambda i: (0, 0), **wkw),     # b2: resident
            ],
            out_specs=pl.BlockSpec((tm, Op), lambda i: (i, 0)),     # lane-dense output tile
        ),
        compiler_params=pltpu.CompilerParams(
            dimension_semantics=("parallel",),   # megacore sharding of the batch grid on v7x
            vmem_limit_bytes=vmem_limit,
        ),
        cost_estimate=cost,
    )


def mlp_forward(x, params, *, tm=256):
    """x: (B, E). params: output of prepare_mlp_params. tm: batch tile (sweep 128-512)."""
    E, H, O, Ep, Hp, Op = params["dims"]
    cdt = params["compute_dtype"]
    B = x.shape[0]

    # Clamp the batch tile: big enough to amortize per-step overhead and feed the 256-wide MXU,
    # but never larger than the (padded) batch so tiny batches run as grid=(1,) on one core.
    tm = max(16, min(tm, _round_up(B, 16)))
    tm = _round_up(tm, 16)
    Bp = _round_up(B, tm)

    # Pad x only when there is a partial last batch tile or E is not sublane-aligned; on the
    # common production path this is a no-op (no extra wrapper-side HBM pass over activations).
    if (Bp != B) or (Ep != E):
        x = jnp.pad(x, ((0, Bp - B), (0, Ep - E)))
    xp = x.astype(cdt)

    wbytes = cdt.itemsize
    vmem_limit = _vmem_limit_bytes()
    # Resident-weight budget: single-buffered weights + double-buffered x/out tiles + f32 h.
    resident = (Ep * Hp + Hp * Op) * wbytes + (Hp + Op) * 4
    streamed = 2 * (tm * Ep * wbytes + tm * Op * 4) + tm * Hp * 4
    if resident + streamed > vmem_limit:
        # TODO(synk): switch to the K-tiled (reduction-axis) layout here instead of failing.
        raise NotImplementedError(
            "Resident-weight layout exceeds the VMEM budget; K-tiling fallback not implemented.")

    cost = pl.CostEstimate(
        flops=2 * Bp * (Ep * Hp + Hp * Op),
        transcendentals=0,
        bytes_accessed=(Bp * Ep * wbytes + (Ep * Hp + Hp * Op) * wbytes
                        + (Hp + Op) * 4 + Bp * Op * 4),
    )

    # Constant-index-map weights only need one VMEM buffer (they never change across the batch
    # grid); fall back to default double-buffering if this jax build rejects pipeline_mode here.
    args = (xp, params["w1"], params["b1"], params["w2"], params["b2"])
    try:
        call = _build_call(tm, Bp, Ep, Hp, Op, vmem_limit, cost, pl.Buffered(1))
        out = call(*args)
    except Exception:
        call = _build_call(tm, Bp, Ep, Hp, Op, vmem_limit, cost, None)
        out = call(*args)
    return out[:B, :O]


def reference_forward(x, w1, b1, gamma, beta, running_mean, running_var, w2, b2, eps=1e-5):
    h = x @ w1.T + b1
    h = (h - running_mean) / jnp.sqrt(running_var + eps) * gamma + beta
    h = jnp.maximum(h, 0.0)
    return h @ w2.T + b2


if __name__ == "__main__":
    # Small deterministic setup: batch=64, embedding_dim=32, hidden_dim=64, out_dim=16.
    B, E, H, O = 64, 32, 64, 16

    key = jax.random.PRNGKey(0)
    kx, kw1, kb1, kw2, kb2, kg, kbt = jax.random.split(key, 7)

    x = jax.random.normal(kx, (B, E), dtype=jnp.float32)

    bound1 = 1.0 / (E ** 0.5)
    w1 = jax.random.uniform(kw1, (H, E), minval=-bound1, maxval=bound1, dtype=jnp.float32)
    b1 = jax.random.uniform(kb1, (H,), minval=-bound1, maxval=bound1, dtype=jnp.float32)
    bound2 = 1.0 / (H ** 0.5)
    w2 = jax.random.uniform(kw2, (O, H), minval=-bound2, maxval=bound2, dtype=jnp.float32)
    b2 = jax.random.uniform(kb2, (O,), minval=-bound2, maxval=bound2, dtype=jnp.float32)

    # BatchNorm1d params perturbed deterministically so the BN path is actually exercised.
    gamma = 1.0 + 0.1 * jax.random.normal(kg, (H,), dtype=jnp.float32)
    beta = 0.1 * jax.random.normal(kbt, (H,), dtype=jnp.float32)
    running_mean = 0.05 * jnp.arange(H, dtype=jnp.float32) / H
    running_var = 1.0 + 0.1 * jnp.cos(jnp.arange(H, dtype=jnp.float32))

    ref = reference_forward(x, w1, b1, gamma, beta, running_mean, running_var, w2, b2)

    # Strict-precision path (f32 end-to-end): must match the PyTorch eval forward to 1e-4.
    params_f32 = prepare_mlp_params(w1, b1, gamma, beta, running_mean, running_var, w2, b2,
                                    compute_dtype=jnp.float32)
    out_f32 = jax.block_until_ready(mlp_forward(x, params_f32))
    assert out_f32.shape == (B, O)
    assert jnp.allclose(out_f32, ref, atol=1e-4, rtol=1e-4), "f32 mismatch vs. reference"

    # Production path (bf16 operands, f32 accumulation + f32 epilogue): looser tolerance.
    params_bf16 = prepare_mlp_params(w1, b1, gamma, beta, running_mean, running_var, w2, b2,
                                     compute_dtype=jnp.bfloat16)
    out_bf16 = jax.block_until_ready(mlp_forward(x, params_bf16))
    assert out_bf16.shape == (B, O)
    assert jnp.allclose(out_bf16, ref, atol=5e-2, rtol=5e-2), "bf16 mismatch vs. reference"

    print("KERNEL_OK")
</pallas_src>

<mosaic_0001>
module attributes {stable_mosaic.version = 11 : i64} {
  func.func @mlp_kernel(%arg0: i32, %arg1: memref<64x32xf32, #tpu.memory_space<vmem>>, %arg2: memref<32x128xf32, #tpu.memory_space<vmem>>, %arg3: memref<1x128xf32, #tpu.memory_space<vmem>>, %arg4: memref<128x128xf32, #tpu.memory_space<vmem>>, %arg5: memref<1x128xf32, #tpu.memory_space<vmem>>, %arg6: memref<64x128xf32, #tpu.memory_space<vmem>>) attributes {dimension_semantics = [#tpu.dimension_semantics<parallel>], iteration_bounds = array<i64: 1>, scalar_prefetch = 0 : i64, scratch_operands = 0 : i64, tpu.core_type = #tpu.core_type<tc>, window_params = [{transform_indices = @transform_0, window_bounds = array<i64: 64, 32>}, {pipeline_mode = #tpu.pipeline_mode<synchronous>, transform_indices = @transform_1, window_bounds = array<i64: 32, 128>}, {pipeline_mode = #tpu.pipeline_mode<synchronous>, transform_indices = @transform_2, window_bounds = array<i64: 1, 128>}, {pipeline_mode = #tpu.pipeline_mode<synchronous>, transform_indices = @transform_3, window_bounds = array<i64: 128, 128>}, {pipeline_mode = #tpu.pipeline_mode<synchronous>, transform_indices = @transform_4, window_bounds = array<i64: 1, 128>}, {transform_indices = @transform_5, window_bounds = array<i64: 64, 128>}]} {
    %c0 = arith.constant 0 : index
    %c0_0 = arith.constant 0 : index
    %0 = vector.load %arg1[%c0, %c0_0] : memref<64x32xf32, #tpu.memory_space<vmem>>, vector<64x32xf32>
    %c0_1 = arith.constant 0 : index
    %c0_2 = arith.constant 0 : index
    %1 = vector.load %arg2[%c0_1, %c0_2] : memref<32x128xf32, #tpu.memory_space<vmem>>, vector<32x128xf32>
    %cst = arith.constant dense<0.000000e+00> : vector<64x128xf32>
    %2 = tpu.matmul %0, %1, %cst {dimension_numbers = #tpu.dot_dimension_numbers<[1], [0], [0], [1], [0, 0, 1, 1], [], []>} : vector<64x32xf32>, vector<32x128xf32>, vector<64x128xf32> -> vector<64x128xf32>
    %c0_3 = arith.constant 0 : index
    %c0_4 = arith.constant 0 : index
    %3 = vector.load %arg3[%c0_3, %c0_4] : memref<1x128xf32, #tpu.memory_space<vmem>>, vector<1x128xf32>
    %4 = vector.broadcast %3 : vector<1x128xf32> to vector<64x128xf32>
    %5 = arith.addf %2, %4 : vector<64x128xf32>
    %cst_5 = arith.constant 0.000000e+00 : f32
    %6 = vector.broadcast %cst_5 : f32 to vector<64x128xf32>
    %7 = arith.maximumf %5, %6 : vector<64x128xf32>
    %c0_6 = arith.constant 0 : index
    %c0_7 = arith.constant 0 : index
    %8 = vector.load %arg4[%c0_6, %c0_7] : memref<128x128xf32, #tpu.memory_space<vmem>>, vector<128x128xf32>
    %cst_8 = arith.constant dense<0.000000e+00> : vector<64x128xf32>
    %9 = tpu.matmul %7, %8, %cst_8 {dimension_numbers = #tpu.dot_dimension_numbers<[1], [0], [0], [1], [0, 0, 1, 1], [], []>} : vector<64x128xf32>, vector<128x128xf32>, vector<64x128xf32> -> vector<64x128xf32>
    %c0_9 = arith.constant 0 : index
    %c0_10 = arith.constant 0 : index
    %10 = vector.load %arg5[%c0_9, %c0_10] : memref<1x128xf32, #tpu.memory_space<vmem>>, vector<1x128xf32>
    %11 = vector.broadcast %10 : vector<1x128xf32> to vector<64x128xf32>
    %12 = arith.addf %9, %11 : vector<64x128xf32>
    %c0_11 = arith.constant 0 : index
    %c0_12 = arith.constant 0 : index
    %13 = vector.load %arg6[%c0_11, %c0_12] : memref<64x128xf32, #tpu.memory_space<vmem>>, vector<64x128xf32>
    tpu.vector_store %arg6[%c0_11, %c0_12], %12 {strides = array<i32>} : memref<64x128xf32, #tpu.memory_space<vmem>>, vector<64x128xf32>,
    return
  }
  func.func @transform_0(%arg0: i32) -> (i32, i32) {
    %c0_i32 = arith.constant 0 : i32
    %c0_i32_0 = arith.constant 0 : i32
    return %arg0, %c0_i32 : i32, i32
  }
  func.func @transform_1(%arg0: i32) -> (i32, i32) {
    %c0_i32 = arith.constant 0 : i32
    %c0_i32_0 = arith.constant 0 : i32
    %c0_i32_1 = arith.constant 0 : i32
    return %c0_i32, %c0_i32_0 : i32, i32
  }
  func.func @transform_2(%arg0: i32) -> (i32, i32) {
    %c0_i32 = arith.constant 0 : i32
    %c0_i32_0 = arith.constant 0 : i32
    %c0_i32_1 = arith.constant 0 : i32
    return %c0_i32, %c0_i32_0 : i32, i32
  }
  func.func @transform_3(%arg0: i32) -> (i32, i32) {
    %c0_i32 = arith.constant 0 : i32
    %c0_i32_0 = arith.constant 0 : i32
    %c0_i32_1 = arith.constant 0 : i32
    return %c0_i32, %c0_i32_0 : i32, i32
  }
  func.func @transform_4(%arg0: i32) -> (i32, i32) {
    %c0_i32 = arith.constant 0 : i32
    %c0_i32_0 = arith.constant 0 : i32
    %c0_i32_1 = arith.constant 0 : i32
    return %c0_i32, %c0_i32_0 : i32, i32
  }
  func.func @transform_5(%arg0: i32) -> (i32, i32) {
    %c0_i32 = arith.constant 0 : i32
    %c0_i32_0 = arith.constant 0 : i32
    return %arg0, %c0_i32 : i32, i32
  }
}

module attributes {stable_mosaic.version = 11 : i64} {
  func.func @mlp_kernel(%arg0: i32, %arg1: memref<64x32xf32, #tpu.memory_space<vmem>>, %arg2: memref<32x128xf32, #tpu.memory_space<vmem>>, %arg3: memref<1x128xf32, #tpu.memory_space<vmem>>, %arg4: memref<128x128xf32, #tpu.memory_space<vmem>>, %arg5: memref<1x128xf32, #tpu.memory_space<vmem>>, %arg6: memref<64x128xf32, #tpu.memory_space<vmem>>) attributes {dimension_semantics = [#tpu.dimension_semantics<parallel>], iteration_bounds = array<i64: 1>, scalar_prefetch = 0 : i64, scratch_operands = 0 : i64, tpu.core_type = #tpu.core_type<tc>, window_params = [{transform_indices = @transform_0, window_bounds = array<i64: 64, 32>}, {pipeline_mode = #tpu.pipeline_mode<synchronous>, transform_indices = @transform_1, window_bounds = array<i64: 32, 128>}, {pipeline_mode = #tpu.pipeline_mode<synchronous>, transform_indices = @transform_2, window_bounds = array<i64: 1, 128>}, {pipeline_mode = #tpu.pipeline_mode<synchronous>, transform_indices = @transform_3, window_bounds = array<i64: 128, 128>}, {pipeline_mode = #tpu.pipeline_mode<synchronous>, transform_indices = @transform_4, window_bounds = array<i64: 1, 128>}, {transform_indices = @transform_5, window_bounds = array<i64: 64, 128>}]} {
    %c0 = arith.constant 0 : index
    %c0_0 = arith.constant 0 : index
    %0 = vector.load %arg1[%c0, %c0_0] : memref<64x32xf32, #tpu.memory_space<vmem>>, vector<64x32xf32>
    %c0_1 = arith.constant 0 : index
    %c0_2 = arith.constant 0 : index
    %1 = vector.load %arg2[%c0_1, %c0_2] : memref<32x128xf32, #tpu.memory_space<vmem>>, vector<32x128xf32>
    %cst = arith.constant dense<0.000000e+00> : vector<64x128xf32>
    %2 = tpu.matmul %0, %1, %cst {dimension_numbers = #tpu.dot_dimension_numbers<[1], [0], [0], [1], [0, 0, 1, 1], [], []>} : vector<64x32xf32>, vector<32x128xf32>, vector<64x128xf32> -> vector<64x128xf32>
    %c0_3 = arith.constant 0 : index
    %c0_4 = arith.constant 0 : index
    %3 = vector.load %arg3[%c0_3, %c0_4] : memref<1x128xf32, #tpu.memory_space<vmem>>, vector<1x128xf32>
    %4 = vector.broadcast %3 : vector<1x128xf32> to vector<64x128xf32>
    %5 = arith.addf %2, %4 : vector<64x128xf32>
    %cst_5 = arith.constant 0.000000e+00 : f32
    %6 = vector.broadcast %cst_5 : f32 to vector<64x128xf32>
    %7 = arith.maximumf %5, %6 : vector<64x128xf32>
    %c0_6 = arith.constant 0 : index
    %c0_7 = arith.constant 0 : index
    %8 = vector.load %arg4[%c0_6, %c0_7] : memref<128x128xf32, #tpu.memory_space<vmem>>, vector<128x128xf32>
    %cst_8 = arith.constant dense<0.000000e+00> : vector<64x128xf32>
    %9 = tpu.matmul %7, %8, %cst_8 {dimension_numbers = #tpu.dot_dimension_numbers<[1], [0], [0], [1], [0, 0, 1, 1], [], []>} : vector<64x128xf32>, vector<128x128xf32>, vector<64x128xf32> -> vector<64x128xf32>
    %c0_9 = arith.constant 0 : index
    %c0_10 = arith.constant 0 : index
    %10 = vector.load %arg5[%c0_9, %c0_10] : memref<1x128xf32, #tpu.memory_space<vmem>>, vector<1x128xf32>
    %11 = vector.broadcast %10 : vector<1x128xf32> to vector<64x128xf32>
    %12 = arith.addf %9, %11 : vector<64x128xf32>
    %c0_11 = arith.constant 0 : index
    %c0_12 = arith.constant 0 : index
    %13 = vector.load %arg6[%c0_11, %c0_12] : memref<64x128xf32, #tpu.memory_space<vmem>>, vector<64x128xf32>
    tpu.vector_store %arg6[%c0_11, %c0_12], %12 {strides = array<i32>} : memref<64x128xf32, #tpu.memory_space<vmem>>, vector<64x128xf32>,
    return
  }
  func.func @transform_0(%arg0: i32) -> (i32, i32) {
    %c0_i32 = arith.constant 0 : i32
    %c0_i32_0 = arith.constant 0 : i32
    return %arg0, %c0_i32 : i32, i32
  }
  func.func @transform_1(%arg0: i32) -> (i32, i32) {
    %c0_i32 = arith.constant 0 : i32
    %c0_i32_0 = arith.constant 0 : i32
    %c0_i32_1 = arith.constant 0 : i32
    return %c0_i32, %c0_i32_0 : i32, i32
  }
  func.func @transform_2(%arg0: i32) -> (i32, i32) {
    %c0_i32 = arith.constant 0 : i32
    %c0_i32_0 = arith.constant 0 : i32
    %c0_i32_1 = arith.constant 0 : i32
    return %c0_i32, %c0_i32_0 : i32, i32
  }
  func.func @transform_3(%arg0: i32) -> (i32, i32) {
    %c0_i32 = arith.constant 0 : i32
    %c0_i32_0 = arith.constant 0 : i32
    %c0_i32_1 = arith.constant 0 : i32
    return %c0_i32, %c0_i32_0 : i32, i32
  }
  func.func @transform_4(%arg0: i32) -> (i32, i32) {
    %c0_i32 = arith.constant 0 : i32
    %c0_i32_0 = arith.constant 0 : i32
    %c0_i32_1 = arith.constant 0 : i32
    return %c0_i32, %c0_i32_0 : i32, i32
  }
  func.func @transform_5(%arg0: i32) -> (i32, i32) {
    %c0_i32 = arith.constant 0 : i32
    %c0_i32_0 = arith.constant 0 : i32
    return %arg0, %c0_i32 : i32, i32
  }
}

</mosaic_0001>

<bundles_post_ra>
// kernel: tpu_custom_call.1
= control target key start
LH: loop header
LB: loop body
LE: loop exit
PB: predicated region body
PF: predicated region fallthrough
CT: control target
= control target key end

     0   :  { %10 = vsyncpa [#allocation3], 0  ;;  %s413_s0 = inlined_call_operand.vmem [shape: f32[64,32], index: 0, kind: input, shape index: {}]   ;;  %s414_s1 = inlined_call_operand.vmem [shape: f32[32,128], index: 1, kind: input, shape index: {}]   ;;  %s415_s2 = inlined_call_operand.vmem [shape: f32[1,128], index: 2, kind: input, shape index: {}]   ;;  %s416_s3 = inlined_call_operand.hbm [shape: f32[128,128], index: 3, kind: input, shape index: {}]   ;;  %s417_s4 = inlined_call_operand.vmem [shape: f32[1,128], index: 4, kind: input, shape index: {}]   ;;  %s418_s5 = inlined_call_operand.hbm [shape: f32[64,128], index: 5, kind: output, shape index: {}]  }
   0x1   :  { %11 = vsyncpa [#allocation4], 0  ;;  %s22_s20 = sshll.u32 %s416_s3, 4  ;;  %s317_s21 = smov [#allocation2]   ;;  %s23_s20 = int_to_ptr.hbm [resolvable:$true] %s22_s20 }
   0x2   :  { %s24_s22 = sshll.u32 %s317_s21, 4  ;;  %s318_s23 = smov 128   ;;  %s25_s22 = int_to_ptr.vmem [resolvable:$true] %s24_s22 }
   0x3   :  { %s319_s24 = smov 8  }
   0x4   :  { %30 = dma.hbm_to_vmem [thread:$0]  %s23_s20, 2048, %s25_s22, [#allocation3], %s318_s23, %s318_s23, %s319_s24  }
   0x5   :  { %313 = dma.done.wait [#allocation3], 2048  }
   0x6   :  { %314 = vsyncadd [#allocation3], 4294965248  ;;  %v48_v0 = vld [vmem:[%s414_s1 + $0x18] sm:$0xff]  ;;  %v47_v1 = vld [vmem:[%s414_s1 + $0x10] sm:$0xff]  ;;  %vm53_vm0 = vcmask 261120   ;;  %s202_s3 = sshll.u32 %s418_s5, 4  ;;  %s203_s3 = int_to_ptr.hbm [resolvable:$true] %s202_s3 }
   0x7   :  { %90 = vmatpush.msra.mxu0 %v48_v0  ;;  %223 = vmatpush.msra.mxu3 %v48_v0  ;;  %v46_v2 = vld [vmem:[%s414_s1 + $0x8] sm:$0xff]  ;;  %v45_v3 = vld [vmem:[%s414_s1] sm:$0xff]  ;;  %v43_v5 = vld [vmem:[%s413_s0 + $0x30] sm:$0xff] }
   0x8   :  { %v37_v4 = vld [vmem:[%s413_s0] sm:$0xff]  ;;  %v38_v6 = vld [vmem:[%s413_s0 + $0x8] sm:$0xff]  ;;  %v44_v7 = vld [vmem:[%s413_s0 + $0x38] sm:$0xff] }
   0x9   :  { %91 = vmatpush.msra.mxu0 %v47_v1  ;;  %224 = vmatpush.msra.mxu3 %v47_v1  ;;  %v142_v8 = vld [vmem:[#allocation2 + $0x78] sm:$0xff]  ;;  %v141_v9 = vld [vmem:[#allocation2 + $0x70] sm:$0xff]  ;;  %v140_v10 = vld [vmem:[#allocation2 + $0x68] sm:$0xff] }
   0xa   :  { %147 = vmatpush.msra.mxu1 %v142_v8  ;;  %227 = vmatpush.msra.mxu2 %v142_v8  ;;  %v139_v11 = vld [vmem:[#allocation2 + $0x60] sm:$0xff]  ;;  %v39_v12 = vld [vmem:[%s413_s0 + $0x10] sm:$0xff]  ;;  %v138_v13 = vld [vmem:[#allocation2 + $0x58] sm:$0xff] }
   0xb   :  { %92 = vmatpush.msra.mxu0 %v46_v2  ;;  %225 = vmatpush.msra.mxu3 %v46_v2  ;;  %v137_v14 = vld [vmem:[#allocation2 + $0x50] sm:$0xff]  ;;  %v136_v15 = vld [vmem:[#allocation2 + $0x48] sm:$0xff]  ;;  %v135_v16 = vld [vmem:[#allocation2 + $0x40] sm:$0xff] }
   0xc   :  { %148 = vmatpush.msra.mxu1 %v141_v9  ;;  %229 = vmatpush.msra.mxu2 %v141_v9  ;;  %v40_v17 = vld [vmem:[%s413_s0 + $0x18] sm:$0xff]  ;;  %v133_v19 = vld [vmem:[#allocation2 + $0x30] sm:$0xff]  ;;  %v132_v20 = vld [vmem:[#allocation2 + $0x28] sm:$0xff] }
   0xd   :  { %93 = vmatpush.msra.mxu0 %v45_v3  ;;  %226 = vmatpush.msra.mxu3 %v45_v3  ;;  %v134_v18 = vld [vmem:[#allocation2 + $0x38] sm:$0xff]  ;;  %v131_v21 = vld [vmem:[#allocation2 + $0x20] sm:$0xff]  ;;  %v42_v24 = vld [vmem:[%s413_s0 + $0x28] sm:$0xff] }
   0xe   :  { %215 = vmatmul.msk.f32.vlgmr.msra.gmra.mxu0 %vm53_vm0, %v37_v4  ;;  %221 = vmatmul.msk.f32.vlgmr.msra.gmra.mxu3 %vm53_vm0, %v43_v5  ;;  %v41_v22 = vld [vmem:[%s413_s0 + $0x20] sm:$0xff]  ;;  %v130_v23 = vld [vmem:[#allocation2 + $0x18] sm:$0xff]  ;;  %v129_v25 = vld [vmem:[#allocation2 + $0x10] sm:$0xff] }
   0xf   :  { %228 = vmatpush.msrb.mxu3 %v142_v8  ;;  %149 = vmatpush.msra.mxu1 %v140_v10  ;;  %v128_v26 = vld [vmem:[#allocation2 + $0x8] sm:$0xff]  ;;  %v127_v27 = vld [vmem:[#allocation2] sm:$0xff] }
  0x10   :  { %231 = vmatpush.msra.mxu2 %v140_v10  ;;  %v263_v28 = vld [vmem:[%s415_s2] ss:$0 sm:$0xff] }
  0x11   :  { %230 = vmatpush.msrb.mxu3 %v141_v9  ;;  %150 = vmatpush.msra.mxu1 %v139_v11  ;;  %v264_v53 = vld [vmem:[%s417_s4] ss:$0 sm:$0xff]  ;;  %s320_s4 = smov [#allocation5]  }
  0x12   :  { %233 = vmatpush.msra.mxu2 %v139_v11  ;;  %s200_s26 = sshll.u32 %s320_s4, 4  ;;  %s201_s26 = int_to_ptr.vmem [resolvable:$true] %s200_s26 }
  0x13   :  { %232 = vmatpush.msrb.mxu3 %v140_v10  ;;  %151 = vmatpush.msra.mxu1 %v138_v13 }
  0x14   :  { %235 = vmatpush.msra.mxu2 %v138_v13 }
  0x15   :  { %234 = vmatpush.msrb.mxu3 %v139_v11  ;;  %152 = vmatpush.msra.mxu1 %v137_v14 }
  0x16   :  { %216 = vmatmul.msk.f32.gmra.mxu0 %vm53_vm0, %v38_v6  ;;  %222 = vmatmul.msk.f32.gmra.mxu3 %vm53_vm0, %v44_v7 }
  0x17   :  { %236 = vmatpush.msrb.mxu3 %v138_v13  ;;  %237 = vmatpush.msra.mxu2 %v137_v14 }
  0x18   :  { %153 = vmatpush.msra.mxu1 %v136_v15 }
  0x19   :  { %238 = vmatpush.msrb.mxu3 %v137_v14  ;;  %239 = vmatpush.msra.mxu2 %v136_v15 }
  0x1a   :  { %154 = vmatpush.msra.mxu1 %v135_v16 }
  0x1b   :  { %240 = vmatpush.msrb.mxu3 %v136_v15  ;;  %241 = vmatpush.msra.mxu2 %v135_v16 }
  0x1c   :  { %155 = vmatpush.msra.mxu1 %v134_v18 }
  0x1d   :  { %242 = vmatpush.msrb.mxu3 %v135_v16  ;;  %243 = vmatpush.msra.mxu2 %v134_v18 }
  0x1e   :  { %217 = vmatmul.msk.f32.gmra.mxu0 %vm53_vm0, %v39_v12  ;;  %156 = vmatpush.msra.mxu1 %v133_v19 }
  0x1f   :  { %244 = vmatpush.msrb.mxu3 %v134_v18  ;;  %245 = vmatpush.msra.mxu2 %v133_v19 }
  0x20   :  { %157 = vmatpush.msra.mxu1 %v132_v20 }
  0x21   :  { %246 = vmatpush.msrb.mxu3 %v133_v19  ;;  %247 = vmatpush.msra.mxu2 %v132_v20 }
  0x22   :  { %158 = vmatpush.msra.mxu1 %v131_v21 }
  0x23   :  { %248 = vmatpush.msrb.mxu3 %v132_v20  ;;  %249 = vmatpush.msra.mxu2 %v131_v21 }
  0x24   :  { %159 = vmatpush.msra.mxu1 %v130_v23 }
  0x25   :  { %250 = vmatpush.msrb.mxu3 %v131_v21  ;;  %251 = vmatpush.msra.mxu2 %v130_v23 }
  0x26   :  { %218 = vmatmul.msk.f32.gmra.mxu0 %vm53_vm0, %v40_v17  ;;  %160 = vmatpush.msra.mxu1 %v129_v25 }
  0x27   :  { %252 = vmatpush.msrb.mxu3 %v130_v23  ;;  %253 = vmatpush.msra.mxu2 %v129_v25 }
  0x28   :  { %161 = vmatpush.msra.mxu1 %v128_v26 }
  0x29   :  { %254 = vmatpush.msrb.mxu3 %v129_v25  ;;  %255 = vmatpush.msra.mxu2 %v128_v26 }
  0x2a   :  { %162 = vmatpush.msra.mxu1 %v127_v27 }
  0x2b   :  { %256 = vmatpush.msrb.mxu3 %v128_v26  ;;  %257 = vmatpush.msra.mxu2 %v127_v27 }
  0x2d   :  { %258 = vmatpush.msrb.mxu3 %v127_v27 }
  0x2e   :  { %219 = vmatmul.msk.f32.gmra.mxu0 %vm53_vm0, %v41_v22 }
  0x36   :  { %220 = vmatmul.msk.f32.gmra.mxu0 %vm53_vm0, %v42_v24 }
  0x8b   :  { %v95_v29 = vpop.f32.mrf.mxu0 }
  0x8c   :  { %v96_v30 = vadd.f32 %v263_v28, %v95_v29 }
  0x8e   :  { %v119_v31 = vmax.f32 %v96_v30, 0.0 }
  0x90   :  { %163 = vmatmul.f32.vlgmr.msra.gmra.mxu1 %v119_v31 }
  0x91   :  { %v113_v32 = vpop.f32.mrf.mxu3 }
  0x92   :  { %v114_v33 = vadd.f32 %v263_v28, %v113_v32 }
  0x93   :  { %v98_v34 = vpop.f32.mrf.mxu0 }
  0x94   :  { %v99_v35 = vadd.f32 %v263_v28, %v98_v34  ;;  %v125_v36 = vmax.f32 %v114_v33, 0.0 }
  0x96   :  { %v120_v37 = vmax.f32 %v99_v35, 0.0  ;;  %181 = vmatmul.f32.vlgmr.msrb.gmra.mxu3 %v125_v36 }
  0x98   :  { %166 = vmatmul.f32.gmra.mxu1 %v120_v37 }
  0x99   :  { %v116_v38 = vpop.f32.mrf.mxu3 }
  0x9a   :  { %v117_v39 = vadd.f32 %v263_v28, %v116_v38 }
  0x9b   :  { %v101_v40 = vpop.f32.mrf.mxu0 }
  0x9c   :  { %v102_v41 = vadd.f32 %v263_v28, %v101_v40  ;;  %v126_v42 = vmax.f32 %v117_v39, 0.0 }
  0x9e   :  { %v121_v43 = vmax.f32 %v102_v41, 0.0  ;;  %184 = vmatmul.f32.gmra.mxu3 %v126_v42 }
  0xa0   :  { %169 = vmatmul.f32.gmra.mxu1 %v121_v43 }
  0xa3   :  { %v104_v44 = vpop.f32.mrf.mxu0 }
  0xa4   :  { %v105_v45 = vadd.f32 %v263_v28, %v104_v44 }
  0xa6   :  { %v122_v46 = vmax.f32 %v105_v45, 0.0 }
  0xa8   :  { %172 = vmatmul.f32.vlgmr.msra.gmra.mxu2 %v122_v46 }
  0xab   :  { %v107_v47 = vpop.f32.mrf.mxu0 }
  0xac   :  { %v108_v48 = vadd.f32 %v263_v28, %v107_v47 }
  0xae   :  { %v123_v49 = vmax.f32 %v108_v48, 0.0 }
  0xb0   :  { %175 = vmatmul.f32.gmra.mxu2 %v123_v49 }
  0xb3   :  { %v110_v50 = vpop.f32.mrf.mxu0 }
  0xb4   :  { %v111_v51 = vadd.f32 %v263_v28, %v110_v50 }
  0xb6   :  { %v124_v52 = vmax.f32 %v111_v51, 0.0 }
  0xb8   :  { %178 = vmatmul.f32.gmra.mxu2 %v124_v52 }
 0x10d   :  { %v164_v54 = vpop.f32.mrf.mxu1 }
 0x10e   :  { %v165_v55 = vadd.f32 %v264_v53, %v164_v54 }
 0x110   :  { %188 = vst [vmem:[#allocation5] sm:$0xff] %v165_v55 }
 0x115   :  { %v167_v56 = vpop.f32.mrf.mxu1 }
 0x116   :  { %v168_v57 = vadd.f32 %v264_v53, %v167_v56 }
 0x118   :  { %189 = vst [vmem:[#allocation5 + $0x8] sm:$0xff] %v168_v57 }
 0x119   :  { %v182_v58 = vpop.f32.mrf.mxu3 }
 0x11a   :  { %v183_v59 = vadd.f32 %v264_v53, %v182_v58 }
 0x11c   :  { %194 = vst [vmem:[#allocation5 + $0x30] sm:$0xff] %v183_v59 }
 0x11d   :  { %v170_v60 = vpop.f32.mrf.mxu1 }
 0x11e   :  { %v171_v61 = vadd.f32 %v264_v53, %v170_v60 }
 0x120   :  { %190 = vst [vmem:[#allocation5 + $0x10] sm:$0xff] %v171_v61 }
 0x121   :  { %v185_v62 = vpop.f32.mrf.mxu3 }
 0x122   :  { %v186_v63 = vadd.f32 %v264_v53, %v185_v62 }
 0x124   :  { %195 = vst [vmem:[#allocation5 + $0x38] sm:$0xff] %v186_v63 }
 0x12b   :  { %v173_v0 = vpop.f32.mrf.mxu2 }
 0x12c   :  { %v174_v1 = vadd.f32 %v264_v53, %v173_v0 }
 0x12e   :  { %191 = vst [vmem:[#allocation5 + $0x18] sm:$0xff] %v174_v1 }
 0x133   :  { %v176_v2 = vpop.f32.mrf.mxu2 }
 0x134   :  { %v177_v3 = vadd.f32 %v264_v53, %v176_v2 }
 0x136   :  { %192 = vst [vmem:[#allocation5 + $0x20] sm:$0xff] %v177_v3 }
 0x13b   :  { %v179_v4 = vpop.f32.mrf.mxu2 }
 0x13c   :  { %v180_v5 = vadd.f32 %v264_v53, %v179_v4 }
 0x13e   :  { %193 = vst [vmem:[#allocation5 + $0x28] sm:$0xff] %v180_v5 }
 0x13f   :  { %208 = dma.vmem_to_hbm [thread:$0]  %s201_s26, 1024, %s203_s3, [#allocation4], %s318_s23, %s318_s23, %s319_s24  }
 0x140   :  { %315 = dma.done.wait [#allocation4], 1024  }
 0x141   :  { %316 = vsyncadd [#allocation4], 4294966272 }
 0x142   :  { %213 = vsyncpa [#allocation3], 1 }
 0x143   :  { %214 = vsyncpa [#allocation4], 1 }

// kernel: tpu_custom_call.1
= control target key start
LH: loop header
LB: loop body
LE: loop exit
PB: predicated region body
PF: predicated region fallthrough
CT: control target
= control target key end

     0   :  { %10 = vsyncpa [#allocation3], 0  ;;  %s413_s0 = inlined_call_operand.vmem [shape: f32[64,32], index: 0, kind: input, shape index: {}]   ;;  %s414_s1 = inlined_call_operand.vmem [shape: f32[32,128], index: 1, kind: input, shape index: {}]   ;;  %s415_s2 = inlined_call_operand.vmem [shape: f32[1,128], index: 2, kind: input, shape index: {}]   ;;  %s416_s3 = inlined_call_operand.hbm [shape: f32[128,128], index: 3, kind: input, shape index: {}]   ;;  %s417_s4 = inlined_call_operand.vmem [shape: f32[1,128], index: 4, kind: input, shape index: {}]   ;;  %s418_s5 = inlined_call_operand.hbm [shape: f32[64,128], index: 5, kind: output, shape index: {}]  }
   0x1   :  { %11 = vsyncpa [#allocation4], 0  ;;  %s22_s20 = sshll.u32 %s416_s3, 4  ;;  %s317_s21 = smov [#allocation2]   ;;  %s23_s20 = int_to_ptr.hbm [resolvable:$true] %s22_s20 }
   0x2   :  { %s24_s22 = sshll.u32 %s317_s21, 4  ;;  %s318_s23 = smov 128   ;;  %s25_s22 = int_to_ptr.vmem [resolvable:$true] %s24_s22 }
   0x3   :  { %s319_s24 = smov 8  }
   0x4   :  { %30 = dma.hbm_to_vmem [thread:$0]  %s23_s20, 2048, %s25_s22, [#allocation3], %s318_s23, %s318_s23, %s319_s24  }
   0x5   :  { %313 = dma.done.wait [#allocation3], 2048  }
   0x6   :  { %314 = vsyncadd [#allocation3], 4294965248  ;;  %v48_v0 = vld [vmem:[%s414_s1 + $0x18] sm:$0xff]  ;;  %v47_v1 = vld [vmem:[%s414_s1 + $0x10] sm:$0xff]  ;;  %vm53_vm0 = vcmask 261120   ;;  %s202_s3 = sshll.u32 %s418_s5, 4  ;;  %s203_s3 = int_to_ptr.hbm [resolvable:$true] %s202_s3 }
   0x7   :  { %90 = vmatpush.msra.mxu0 %v48_v0  ;;  %223 = vmatpush.msra.mxu3 %v48_v0  ;;  %v46_v2 = vld [vmem:[%s414_s1 + $0x8] sm:$0xff]  ;;  %v45_v3 = vld [vmem:[%s414_s1] sm:$0xff]  ;;  %v43_v5 = vld [vmem:[%s413_s0 + $0x30] sm:$0xff] }
   0x8   :  { %v37_v4 = vld [vmem:[%s413_s0] sm:$0xff]  ;;  %v38_v6 = vld [vmem:[%s413_s0 + $0x8] sm:$0xff]  ;;  %v44_v7 = vld [vmem:[%s413_s0 + $0x38] sm:$0xff] }
   0x9   :  { %91 = vmatpush.msra.mxu0 %v47_v1  ;;  %224 = vmatpush.msra.mxu3 %v47_v1  ;;  %v142_v8 = vld [vmem:[#allocation2 + $0x78] sm:$0xff]  ;;  %v141_v9 = vld [vmem:[#allocation2 + $0x70] sm:$0xff]  ;;  %v140_v10 = vld [vmem:[#allocation2 + $0x68] sm:$0xff] }
   0xa   :  { %147 = vmatpush.msra.mxu1 %v142_v8  ;;  %227 = vmatpush.msra.mxu2 %v142_v8  ;;  %v139_v11 = vld [vmem:[#allocation2 + $0x60] sm:$0xff]  ;;  %v39_v12 = vld [vmem:[%s413_s0 + $0x10] sm:$0xff]  ;;  %v138_v13 = vld [vmem:[#allocation2 + $0x58] sm:$0xff] }
   0xb   :  { %92 = vmatpush.msra.mxu0 %v46_v2  ;;  %225 = vmatpush.msra.mxu3 %v46_v2  ;;  %v137_v14 = vld [vmem:[#allocation2 + $0x50] sm:$0xff]  ;;  %v136_v15 = vld [vmem:[#allocation2 + $0x48] sm:$0xff]  ;;  %v135_v16 = vld [vmem:[#allocation2 + $0x40] sm:$0xff] }
   0xc   :  { %148 = vmatpush.msra.mxu1 %v141_v9  ;;  %229 = vmatpush.msra.mxu2 %v141_v9  ;;  %v40_v17 = vld [vmem:[%s413_s0 + $0x18] sm:$0xff]  ;;  %v133_v19 = vld [vmem:[#allocation2 + $0x30] sm:$0xff]  ;;  %v132_v20 = vld [vmem:[#allocation2 + $0x28] sm:$0xff] }
   0xd   :  { %93 = vmatpush.msra.mxu0 %v45_v3  ;;  %226 = vmatpush.msra.mxu3 %v45_v3  ;;  %v134_v18 = vld [vmem:[#allocation2 + $0x38] sm:$0xff]  ;;  %v131_v21 = vld [vmem:[#allocation2 + $0x20] sm:$0xff]  ;;  %v42_v24 = vld [vmem:[%s413_s0 + $0x28] sm:$0xff] }
   0xe   :  { %215 = vmatmul.msk.f32.vlgmr.msra.gmra.mxu0 %vm53_vm0, %v37_v4  ;;  %221 = vmatmul.msk.f32.vlgmr.msra.gmra.mxu3 %vm53_vm0, %v43_v5  ;;  %v41_v22 = vld [vmem:[%s413_s0 + $0x20] sm:$0xff]  ;;  %v130_v23 = vld [vmem:[#allocation2 + $0x18] sm:$0xff]  ;;  %v129_v25 = vld [vmem:[#allocation2 + $0x10] sm:$0xff] }
   0xf   :  { %228 = vmatpush.msrb.mxu3 %v142_v8  ;;  %149 = vmatpush.msra.mxu1 %v140_v10  ;;  %v128_v26 = vld [vmem:[#allocation2 + $0x8] sm:$0xff]  ;;  %v127_v27 = vld [vmem:[#allocation2] sm:$0xff] }
  0x10   :  { %231 = vmatpush.msra.mxu2 %v140_v10  ;;  %v263_v28 = vld [vmem:[%s415_s2] ss:$0 sm:$0xff] }
  0x11   :  { %230 = vmatpush.msrb.mxu3 %v141_v9  ;;  %150 = vmatpush.msra.mxu1 %v139_v11  ;;  %v264_v53 = vld [vmem:[%s417_s4] ss:$0 sm:$0xff]  ;;  %s320_s4 = smov [#allocation5]  }
  0x12   :  { %233 = vmatpush.msra.mxu2 %v139_v11  ;;  %s200_s26 = sshll.u32 %s320_s4, 4  ;;  %s201_s26 = int_to_ptr.vmem [resolvable:$true] %s200_s26 }
  0x13   :  { %232 = vmatpush.msrb.mxu3 %v140_v10  ;;  %151 = vmatpush.msra.mxu1 %v138_v13 }
  0x14   :  { %235 = vmatpush.msra.mxu2 %v138_v13 }
  0x15   :  { %234 = vmatpush.msrb.mxu3 %v139_v11  ;;  %152 = vmatpush.msra.mxu1 %v137_v14 }
  0x16   :  { %216 = vmatmul.msk.f32.gmra.mxu0 %vm53_vm0, %v38_v6  ;;  %222 = vmatmul.msk.f32.gmra.mxu3 %vm53_vm0, %v44_v7 }
  0x17   :  { %236 = vmatpush.msrb.mxu3 %v138_v13  ;;  %237 = vmatpush.msra.mxu2 %v137_v14 }
  0x18   :  { %153 = vmatpush.msra.mxu1 %v136_v15 }
  0x19   :  { %238 = vmatpush.msrb.mxu3 %v137_v14  ;;  %239 = vmatpush.msra.mxu2 %v136_v15 }
  0x1a   :  { %154 = vmatpush.msra.mxu1 %v135_v16 }
  0x1b   :  { %240 = vmatpush.msrb.mxu3 %v136_v15  ;;  %241 = vmatpush.msra.mxu2 %v135_v16 }
  0x1c   :  { %155 = vmatpush.msra.mxu1 %v134_v18 }
  0x1d   :  { %242 = vmatpush.msrb.mxu3 %v135_v16  ;;  %243 = vmatpush.msra.mxu2 %v134_v18 }
  0x1e   :  { %217 = vmatmul.msk.f32.gmra.mxu0 %vm53_vm0, %v39_v12  ;;  %156 = vmatpush.msra.mxu1 %v133_v19 }
  0x1f   :  { %244 = vmatpush.msrb.mxu3 %v134_v18  ;;  %245 = vmatpush.msra.mxu2 %v133_v19 }
  0x20   :  { %157 = vmatpush.msra.mxu1 %v132_v20 }
  0x21   :  { %246 = vmatpush.msrb.mxu3 %v133_v19  ;;  %247 = vmatpush.msra.mxu2 %v132_v20 }
  0x22   :  { %158 = vmatpush.msra.mxu1 %v131_v21 }
  0x23   :  { %248 = vmatpush.msrb.mxu3 %v132_v20  ;;  %249 = vmatpush.msra.mxu2 %v131_v21 }
  0x24   :  { %159 = vmatpush.msra.mxu1 %v130_v23 }
  0x25   :  { %250 = vmatpush.msrb.mxu3 %v131_v21  ;;  %251 = vmatpush.msra.mxu2 %v130_v23 }
  0x26   :  { %218 = vmatmul.msk.f32.gmra.mxu0 %vm53_vm0, %v40_v17  ;;  %160 = vmatpush.msra.mxu1 %v129_v25 }
  0x27   :  { %252 = vmatpush.msrb.mxu3 %v130_v23  ;;  %253 = vmatpush.msra.mxu2 %v129_v25 }
  0x28   :  { %161 = vmatpush.msra.mxu1 %v128_v26 }
  0x29   :  { %254 = vmatpush.msrb.mxu3 %v129_v25  ;;  %255 = vmatpush.msra.mxu2 %v128_v26 }
  0x2a   :  { %162 = vmatpush.msra.mxu1 %v127_v27 }
  0x2b   :  { %256 = vmatpush.msrb.mxu3 %v128_v26  ;;  %257 = vmatpush.msra.mxu2 %v127_v27 }
  0x2d   :  { %258 = vmatpush.msrb.mxu3 %v127_v27 }
  0x2e   :  { %219 = vmatmul.msk.f32.gmra.mxu0 %vm53_vm0, %v41_v22 }
  0x36   :  { %220 = vmatmul.msk.f32.gmra.mxu0 %vm53_vm0, %v42_v24 }
  0x8b   :  { %v95_v29 = vpop.f32.mrf.mxu0 }
  0x8c   :  { %v96_v30 = vadd.f32 %v263_v28, %v95_v29 }
  0x8e   :  { %v119_v31 = vmax.f32 %v96_v30, 0.0 }
  0x90   :  { %163 = vmatmul.f32.vlgmr.msra.gmra.mxu1 %v119_v31 }
  0x91   :  { %v113_v32 = vpop.f32.mrf.mxu3 }
  0x92   :  { %v114_v33 = vadd.f32 %v263_v28, %v113_v32 }
  0x93   :  { %v98_v34 = vpop.f32.mrf.mxu0 }
  0x94   :  { %v99_v35 = vadd.f32 %v263_v28, %v98_v34  ;;  %v125_v36 = vmax.f32 %v114_v33, 0.0 }
  0x96   :  { %v120_v37 = vmax.f32 %v99_v35, 0.0  ;;  %181 = vmatmul.f32.vlgmr.msrb.gmra.mxu3 %v125_v36 }
  0x98   :  { %166 = vmatmul.f32.gmra.mxu1 %v120_v37 }
  0x99   :  { %v116_v38 = vpop.f32.mrf.mxu3 }
  0x9a   :  { %v117_v39 = vadd.f32 %v263_v28, %v116_v38 }
  0x9b   :  { %v101_v40 = vpop.f32.mrf.mxu0 }
  0x9c   :  { %v102_v41 = vadd.f32 %v263_v28, %v101_v40  ;;  %v126_v42 = vmax.f32 %v117_v39, 0.0 }
  0x9e   :  { %v121_v43 = vmax.f32 %v102_v41, 0.0  ;;  %184 = vmatmul.f32.gmra.mxu3 %v126_v42 }
  0xa0   :  { %169 = vmatmul.f32.gmra.mxu1 %v121_v43 }
  0xa3   :  { %v104_v44 = vpop.f32.mrf.mxu0 }
  0xa4   :  { %v105_v45 = vadd.f32 %v263_v28, %v104_v44 }
  0xa6   :  { %v122_v46 = vmax.f32 %v105_v45, 0.0 }
  0xa8   :  { %172 = vmatmul.f32.vlgmr.msra.gmra.mxu2 %v122_v46 }
  0xab   :  { %v107_v47 = vpop.f32.mrf.mxu0 }
  0xac   :  { %v108_v48 = vadd.f32 %v263_v28, %v107_v47 }
  0xae   :  { %v123_v49 = vmax.f32 %v108_v48, 0.0 }
  0xb0   :  { %175 = vmatmul.f32.gmra.mxu2 %v123_v49 }
  0xb3   :  { %v110_v50 = vpop.f32.mrf.mxu0 }
  0xb4   :  { %v111_v51 = vadd.f32 %v263_v28, %v110_v50 }
  0xb6   :  { %v124_v52 = vmax.f32 %v111_v51, 0.0 }
  0xb8   :  { %178 = vmatmul.f32.gmra.mxu2 %v124_v52 }
 0x10d   :  { %v164_v54 = vpop.f32.mrf.mxu1 }
 0x10e   :  { %v165_v55 = vadd.f32 %v264_v53, %v164_v54 }
 0x110   :  { %188 = vst [vmem:[#allocation5] sm:$0xff] %v165_v55 }
 0x115   :  { %v167_v56 = vpop.f32.mrf.mxu1 }
 0x116   :  { %v168_v57 = vadd.f32 %v264_v53, %v167_v56 }
 0x118   :  { %189 = vst [vmem:[#allocation5 + $0x8] sm:$0xff] %v168_v57 }
 0x119   :  { %v182_v58 = vpop.f32.mrf.mxu3 }
 0x11a   :  { %v183_v59 = vadd.f32 %v264_v53, %v182_v58 }
 0x11c   :  { %194 = vst [vmem:[#allocation5 + $0x30] sm:$0xff] %v183_v59 }
 0x11d   :  { %v170_v60 = vpop.f32.mrf.mxu1 }
 0x11e   :  { %v171_v61 = vadd.f32 %v264_v53, %v170_v60 }
 0x120   :  { %190 = vst [vmem:[#allocation5 + $0x10] sm:$0xff] %v171_v61 }
 0x121   :  { %v185_v62 = vpop.f32.mrf.mxu3 }
 0x122   :  { %v186_v63 = vadd.f32 %v264_v53, %v185_v62 }
 0x124   :  { %195 = vst [vmem:[#allocation5 + $0x38] sm:$0xff] %v186_v63 }
 0x12b   :  { %v173_v0 = vpop.f32.mrf.mxu2 }
 0x12c   :  { %v174_v1 = vadd.f32 %v264_v53, %v173_v0 }
 0x12e   :  { %191 = vst [vmem:[#allocation5 + $0x18] sm:$0xff] %v174_v1 }
 0x133   :  { %v176_v2 = vpop.f32.mrf.mxu2 }
 0x134   :  { %v177_v3 = vadd.f32 %v264_v53, %v176_v2 }
 0x136   :  { %192 = vst [vmem:[#allocation5 + $0x20] sm:$0xff] %v177_v3 }
 0x13b   :  { %v179_v4 = vpop.f32.mrf.mxu2 }
 0x13c   :  { %v180_v5 = vadd.f32 %v264_v53, %v179_v4 }
 0x13e   :  { %193 = vst [vmem:[#allocation5 + $0x28] sm:$0xff] %v180_v5 }
 0x13f   :  { %208 = dma.vmem_to_hbm [thread:$0]  %s201_s26, 1024, %s203_s3, [#allocation4], %s318_s23, %s318_s23, %s319_s24  }
 0x140   :  { %315 = dma.done.wait [#allocation4], 1024  }
 0x141   :  { %316 = vsyncadd [#allocation4], 4294966272 }
 0x142   :  { %213 = vsyncpa [#allocation3], 1 }
 0x143   :  { %214 = vsyncpa [#allocation4], 1 }

</bundles_post_ra>
